<compile_context>
chip_gen: v6e
topology: v6e:2x2x1
jax: 0.10.0
libtpu: 0.0.40
codegen_flags: <defaults>
</compile_context>

<pallas_src>
import jax
import jax.numpy as jnp
from jax.experimental import pallas as pl
from jax.experimental.pallas import tpu as pltpu

EPS = 1e-5


def _bn_add_kernel(x_ref, skip_ref, w_ref, b_ref, o_ref):
    # x_ref / skip_ref / o_ref: (N, TC, HW)    w_ref / b_ref: (1, TC, 1)
    x = x_ref[...].astype(jnp.float32)
    n_elems = x.shape[0] * x.shape[2]
    inv_n = jnp.float32(1.0 / n_elems)

    # Single pass over x: per-channel sum and sum of squares.
    s1 = jnp.sum(jnp.sum(x, axis=2, keepdims=True), axis=0, keepdims=True)       # (1, TC, 1)
    s2 = jnp.sum(jnp.sum(x * x, axis=2, keepdims=True), axis=0, keepdims=True)   # (1, TC, 1)

    mean = s1 * inv_n
    var = s2 * inv_n - mean * mean                     # biased variance (batch stats)
    inv_std = jax.lax.rsqrt(var + jnp.float32(EPS))

    # Fold affine into per-channel scale / shift: y = x*scale + shift
    scale = w_ref[...].astype(jnp.float32) * inv_std   # (1, TC, 1)
    shift = b_ref[...].astype(jnp.float32) - mean * scale

    o_ref[...] = (x * scale + shift + skip_ref[...].astype(jnp.float32)).astype(o_ref.dtype)


def _pick_tc(N, C, HW, bytes_per_elem=4, budget_bytes=12 * 1024 * 1024):
    """Largest sublane-aligned channel tile whose double-buffered footprint fits.

    Footprint per grid step ~ 2 buffers x 3 big arrays x N x TC x HW x 4 B.
    Budget of 12 MiB stays under the scoped-VMEM default on every generation
    (16 MiB on v5e, 32 MiB on v6e/v7x).  Prefer >= 2 grid steps so v7x's two
    TensorCores both get work.
    """
    def footprint(tc):
        return 2 * 3 * N * tc * HW * bytes_per_elem

    candidates = [tc for tc in (64, 32, 16, 8) if C % tc == 0]
    if not candidates:
        return C  # block == full channel extent; (8,) alignment rule not triggered
    for tc in candidates:                       # largest tile with >= 2 grid steps
        if C // tc >= 2 and footprint(tc) <= budget_bytes:
            return tc
    for tc in candidates:                       # otherwise largest tile that fits
        if footprint(tc) <= budget_bytes:
            return tc
    return candidates[-1]                       # smallest aligned tile as last resort


def batchnorm_add(x18, x5, weight, bias):
    """x18, x5: (N, C, H, W) float32.  Returns x5 + BatchNorm2d(x18) (training-mode stats)."""
    N, C, H, W = x18.shape
    HW = H * W

    # Reshape only (no transposes): channel stays on the sublane axis, HW on lanes.
    xr = x18.reshape(N, C, HW)
    sr = x5.reshape(N, C, HW)
    w = weight.reshape(1, C, 1).astype(jnp.float32)
    b = bias.reshape(1, C, 1).astype(jnp.float32)

    TC = _pick_tc(N, C, HW)

    out = pl.pallas_call(
        _bn_add_kernel,
        out_shape=jax.ShapeDtypeStruct((N, C, HW), x18.dtype),
        grid=(C // TC,),
        in_specs=[
            pl.BlockSpec((N, TC, HW), lambda c: (0, c, 0)),
            pl.BlockSpec((N, TC, HW), lambda c: (0, c, 0)),
            pl.BlockSpec((1, TC, 1), lambda c: (0, c, 0)),
            pl.BlockSpec((1, TC, 1), lambda c: (0, c, 0)),
        ],
        out_specs=pl.BlockSpec((N, TC, HW), lambda c: (0, c, 0)),
        compiler_params=pltpu.CompilerParams(dimension_semantics=("parallel",)),
    )(xr, sr, w, b)

    return out.reshape(N, C, H, W)


def _reference(x18, x5, weight, bias):
    mean = jnp.mean(x18, axis=(0, 2, 3), keepdims=True)
    var = jnp.mean((x18 - mean) ** 2, axis=(0, 2, 3), keepdims=True)
    y = (x18 - mean) / jnp.sqrt(var + EPS)
    y = y * weight[None, :, None, None] + bias[None, :, None, None]
    return x5 + y


if __name__ == "__main__":
    # Small shapes consistent with the module: C must be 64 (BatchNorm2d(64)),
    # batch/spatial shrunk from (1, 64, 56, 56) to (2, 64, 16, 16).
    key = jax.random.PRNGKey(0)
    k1, k2, k3, k4 = jax.random.split(key, 4)
    N, C, H, W = 2, 64, 16, 16

    x18 = jax.random.normal(k1, (N, C, H, W), dtype=jnp.float32)
    x5 = jax.random.normal(k2, (N, C, H, W), dtype=jnp.float32)
    # Deterministic synthetic affine params (PyTorch default would be ones/zeros).
    weight = 1.0 + 0.1 * jax.random.normal(k3, (C,), dtype=jnp.float32)
    bias = 0.1 * jax.random.normal(k4, (C,), dtype=jnp.float32)

    out = batchnorm_add(x18, x5, weight, bias)
    out = jax.block_until_ready(out)

    ref = _reference(x18, x5, weight, bias)
    assert out.shape == (N, C, H, W)
    assert jnp.max(jnp.abs(out - ref)) < 1e-4, "mismatch vs reference"

    print("KERNEL_OK")
</pallas_src>

<mosaic_0001>
module attributes {stable_mosaic.version = 11 : i64} {
  func.func @_bn_add_kernel(%arg0: i32, %arg1: memref<2x32x256xf32, #tpu.memory_space<vmem>>, %arg2: memref<2x32x256xf32, #tpu.memory_space<vmem>>, %arg3: memref<1x32x1xf32, #tpu.memory_space<vmem>>, %arg4: memref<1x32x1xf32, #tpu.memory_space<vmem>>, %arg5: memref<2x32x256xf32, #tpu.memory_space<vmem>>) attributes {dimension_semantics = [#tpu.dimension_semantics<parallel>], iteration_bounds = array<i64: 2>, scalar_prefetch = 0 : i64, scratch_operands = 0 : i64, tpu.core_type = #tpu.core_type<tc>, window_params = [{transform_indices = @transform_0, window_bounds = array<i64: 2, 32, 256>}, {transform_indices = @transform_1, window_bounds = array<i64: 2, 32, 256>}, {transform_indices = @transform_2, window_bounds = array<i64: 1, 32, 1>}, {transform_indices = @transform_3, window_bounds = array<i64: 1, 32, 1>}, {transform_indices = @transform_4, window_bounds = array<i64: 2, 32, 256>}]} {
    %c0 = arith.constant 0 : index
    %c0_0 = arith.constant 0 : index
    %c0_1 = arith.constant 0 : index
    %0 = vector.load %arg1[%c0, %c0_0, %c0_1] : memref<2x32x256xf32, #tpu.memory_space<vmem>>, vector<2x32x256xf32>
    %cst = arith.constant dense<0.000000e+00> : vector<2x32xf32>
    %1 = vector.multi_reduction <add>, %0, %cst [2] : vector<2x32x256xf32> to vector<2x32xf32>
    %2 = vector.shape_cast %1 : vector<2x32xf32> to vector<2x32x1xf32>
    %cst_2 = arith.constant dense<0.000000e+00> : vector<32x1xf32>
    %3 = vector.multi_reduction <add>, %2, %cst_2 [0] : vector<2x32x1xf32> to vector<32x1xf32>
    %4 = vector.shape_cast %3 : vector<32x1xf32> to vector<1x32x1xf32>
    %5 = arith.mulf %0, %0 : vector<2x32x256xf32>
    %cst_3 = arith.constant dense<0.000000e+00> : vector<2x32xf32>
    %6 = vector.multi_reduction <add>, %5, %cst_3 [2] : vector<2x32x256xf32> to vector<2x32xf32>
    %7 = vector.shape_cast %6 : vector<2x32xf32> to vector<2x32x1xf32>
    %cst_4 = arith.constant dense<0.000000e+00> : vector<32x1xf32>
    %8 = vector.multi_reduction <add>, %7, %cst_4 [0] : vector<2x32x1xf32> to vector<32x1xf32>
    %9 = vector.shape_cast %8 : vector<32x1xf32> to vector<1x32x1xf32>
    %cst_5 = arith.constant 0.001953125 : f32
    %10 = vector.broadcast %cst_5 : f32 to vector<1x32x1xf32>
    %11 = arith.mulf %4, %10 : vector<1x32x1xf32>
    %cst_6 = arith.constant 0.001953125 : f32
    %12 = vector.broadcast %cst_6 : f32 to vector<1x32x1xf32>
    %13 = arith.mulf %9, %12 : vector<1x32x1xf32>
    %14 = arith.mulf %11, %11 : vector<1x32x1xf32>
    %15 = arith.subf %13, %14 : vector<1x32x1xf32>
    %cst_7 = arith.constant 9.99999974E-6 : f32
    %16 = vector.broadcast %cst_7 : f32 to vector<1x32x1xf32>
    %17 = arith.addf %15, %16 : vector<1x32x1xf32>
    %18 = math.rsqrt %17 : vector<1x32x1xf32>
    %c0_8 = arith.constant 0 : index
    %c0_9 = arith.constant 0 : index
    %c0_10 = arith.constant 0 : index
    %19 = vector.load %arg3[%c0_8, %c0_9, %c0_10] : memref<1x32x1xf32, #tpu.memory_space<vmem>>, vector<1x32x1xf32>
    %20 = arith.mulf %19, %18 : vector<1x32x1xf32>
    %c0_11 = arith.constant 0 : index
    %c0_12 = arith.constant 0 : index
    %c0_13 = arith.constant 0 : index
    %21 = vector.load %arg4[%c0_11, %c0_12, %c0_13] : memref<1x32x1xf32, #tpu.memory_space<vmem>>, vector<1x32x1xf32>
    %22 = arith.mulf %11, %20 : vector<1x32x1xf32>
    %23 = arith.subf %21, %22 : vector<1x32x1xf32>
    %24 = vector.broadcast %20 : vector<1x32x1xf32> to vector<2x32x256xf32>
    %25 = arith.mulf %0, %24 : vector<2x32x256xf32>
    %26 = vector.broadcast %23 : vector<1x32x1xf32> to vector<2x32x256xf32>
    %27 = arith.addf %25, %26 : vector<2x32x256xf32>
    %c0_14 = arith.constant 0 : index
    %c0_15 = arith.constant 0 : index
    %c0_16 = arith.constant 0 : index
    %28 = vector.load %arg2[%c0_14, %c0_15, %c0_16] : memref<2x32x256xf32, #tpu.memory_space<vmem>>, vector<2x32x256xf32>
    %29 = arith.addf %27, %28 : vector<2x32x256xf32>
    %c0_17 = arith.constant 0 : index
    %c0_18 = arith.constant 0 : index
    %c0_19 = arith.constant 0 : index
    %30 = vector.load %arg5[%c0_17, %c0_18, %c0_19] : memref<2x32x256xf32, #tpu.memory_space<vmem>>, vector<2x32x256xf32>
    tpu.vector_store %arg5[%c0_17, %c0_18, %c0_19], %29 {strides = array<i32>} : memref<2x32x256xf32, #tpu.memory_space<vmem>>, vector<2x32x256xf32>,
    return
  }
  func.func @transform_0(%arg0: i32) -> (i32, i32, i32) {
    %c0_i32 = arith.constant 0 : i32
    %c0_i32_0 = arith.constant 0 : i32
    %c0_i32_1 = arith.constant 0 : i32
    return %c0_i32, %arg0, %c0_i32_0 : i32, i32, i32
  }
  func.func @transform_1(%arg0: i32) -> (i32, i32, i32) {
    %c0_i32 = arith.constant 0 : i32
    %c0_i32_0 = arith.constant 0 : i32
    %c0_i32_1 = arith.constant 0 : i32
    return %c0_i32, %arg0, %c0_i32_0 : i32, i32, i32
  }
  func.func @transform_2(%arg0: i32) -> (i32, i32, i32) {
    %c0_i32 = arith.constant 0 : i32
    %c0_i32_0 = arith.constant 0 : i32
    %c0_i32_1 = arith.constant 0 : i32
    return %c0_i32, %arg0, %c0_i32_0 : i32, i32, i32
  }
  func.func @transform_3(%arg0: i32) -> (i32, i32, i32) {
    %c0_i32 = arith.constant 0 : i32
    %c0_i32_0 = arith.constant 0 : i32
    %c0_i32_1 = arith.constant 0 : i32
    return %c0_i32, %arg0, %c0_i32_0 : i32, i32, i32
  }
  func.func @transform_4(%arg0: i32) -> (i32, i32, i32) {
    %c0_i32 = arith.constant 0 : i32
    %c0_i32_0 = arith.constant 0 : i32
    %c0_i32_1 = arith.constant 0 : i32
    return %c0_i32, %arg0, %c0_i32_0 : i32, i32, i32
  }
}

</mosaic_0001>

<bundles_post_ra>
// kernel: tpu_custom_call.1
= control target key start
LH: loop header
LB: loop body
LE: loop exit
PB: predicated region body
PF: predicated region fallthrough
CT: control target
= control target key end

     0   :  { %s1302_s0 = inlined_call_operand.hbm [shape: f32[2,64,256], index: 0, kind: input, shape index: {}]   ;;  %s1303_s1 = inlined_call_operand.hbm [shape: f32[2,64,256], index: 1, kind: input, shape index: {}]   ;;  %s1304_s2 = inlined_call_operand.vmem [shape: f32[1,64,1], index: 2, kind: input, shape index: {}]   ;;  %s1305_s3 = inlined_call_operand.vmem [shape: f32[1,64,1], index: 3, kind: input, shape index: {}]   ;;  %s1306_s4 = inlined_call_operand.hbm [shape: f32[2,64,256], index: 4, kind: output, shape index: {}]  }
   0x1   :  { %1307 = sst [smem:[#allocation19_spill]] %s1302_s0 }
   0x2   :  { %9 = vsyncpa [#allocation3], 0 }
   0x3   :  { %11 = vsyncpa [#allocation3 + $0x1], 0 }
   0x4   :  { %12 = vsyncpa [#allocation6], 0 }
   0x5   :  { %14 = vsyncpa [#allocation6 + $0x1], 0 }
   0x6   :  { %15 = vsyncpa [#allocation4], 0 }
   0x7   :  { %17 = vsyncpa [#allocation4 + $0x1], 0  ;;  %s982_s15 = smov 0   ;;  %s984_s16 = smov 0  }
   0x8   :  { %s986_s17 = smov 0   ;;  %s988_s18 = smov 0  }
   0x9 LB: > { %s1003_s19 = sadd.s32 4294967295, %s935_s18   ;;  %s765_s20 = sadd.s32 4294967294, %s935_s18   ;;  %s935_s18 = sphi %s988_s18, %s1316_s18   ;;  %s931_s17 = sphi %s986_s17, %s1315_s17   ;;  %s927_s16 = sphi %s984_s16, %s1314_s16   ;;  %s923_s15 = sphi %s982_s15, %s1313_s15  }
   0xa   : > { %s1007_s21 = sadd.s32 1, %s935_s18   ;;  %s30_s22 = sadd.s32 1, %s931_s17 }
   0xb   : > { %s27_s23 = ssub.s32 %s935_s18, %s1007_s21  ;;  %p37_p0 = scmp.ne.s32.totalorder %s931_s17, %s927_s16 }
   0xc   : > { %p28_p1 = scmp.eq.s32.totalorder %s27_s23, 0  ;;  %p38_p2 = scmp.eq.s32.totalorder %s935_s18, 0 }
   0xd   : > { %p43_p3 = scmp.ne.s32.totalorder %s927_s16, %s923_s15  ;;  %p44_p4 = scmp.eq.s32.totalorder %s1003_s19, 0 }
   0xe   : > { %s1019_s24 = scalar_select %p28_p1, %s931_s17, %s30_s22  }
   0xf   : > { %p1021_p5 = por %p38_p2, %p37_p0  ;;  %p1025_p6 = por %p44_p4, %p43_p3 }
  0x10   : > { %p145_p7 = scmp.eq.s32.totalorder %s1003_s19, 1  ;;  %p151_p8 = scmp.eq.s32.totalorder %s765_s20, 1 }
  0x11   : > { %p767_p11 = scmp.ge.s32.totalorder %s935_s18, 2 }
  0x12   : > { %p1030_p9 = por %p145_p7, %p37_p0  ;;  %p1034_p10 = por %p151_p8, %p43_p3 }
  0x13   : > { %167 = sbr.rel (%p767_p11) target bundleno = 50 (0x32), region = 16 }
  0x18   : > { %s1042_s29 = sand.u32 1, %s931_s17   ;;  %s795_s30 = sshll.u32 %s935_s18, 10 }
  0x19   : > { %s768_s5 = sshll.u32 %s1042_s29, 7  ;;  %s1312_s0 = sld [smem:[#allocation19_spill]] }
  0x1a   : > { %s800_s9 = scalar_select %p1021_p5, [#allocation0], [#allocation14] }
  0x1b   : > { %s175_s10 = scalar_lea.vmem [#allocation2], %s768_s5  ;;  %s937_s13 = smov 2048  }
  0x1c   : > { %s195_s11 = sshll.u32 %s175_s10, 4  ;;  %s187_s12 = sld [smem:[%s800_s9]]   ;;  %s196_s11 = int_to_ptr.vmem [resolvable:$true] %s195_s11 }
  0x1d   : > { %801 = sst [smem:[#allocation9]] (%p1021_p5), %s937_s13  ;;  %s938_s14 = smov 1024  }
  0x1e   : > { %802 = sst [smem:[#allocation9 + $0x1]] (%p1021_p5), %s938_s14  ;;  %s939_s20 = smov 4  }
  0x1f   : > { %s182_s8 = scalar_lea.hbm %s1312_s0, %s795_s30  ;;  %803 = sst [smem:[#allocation9 + $0x2]] (%p1021_p5), %s939_s20 }
  0x20   : > { %s940_s22 = smov 256   ;;  %s941_s6 = smov 16  }
  0x21   : > { %804 = sst [smem:[#allocation9 + $0x3]] (%p1021_p5), %s940_s22  ;;  %s172_s9 = scalar_lea.sflag [#allocation3], %s1042_s29 }
  0x22   : > { %805 = sst [smem:[#allocation9 + $0x4]] (%p1021_p5), %s940_s22  ;;  %s772_s23 = sshll.u32 %s187_s12, 26 }
  0x23   : > { %806 = sst [smem:[#allocation9 + $0x5]] (%p1021_p5), %s941_s6  ;;  %s773_s7 = sadd.s32 134217728, %s772_s23 }
  0x24   : > { %s942_s10 = smov 131072  }
  0x25   : > { %807 = dma.general (%p1021_p5), %s182_s8, 2048, %s196_s11, %s172_s9, %s942_s10, [#allocation9], %s773_s7, 0  }
  0x26   : > { %s229_s14 = scalar_lea.hbm %s1303_s1, %s795_s30  ;;  %s222_s20 = scalar_lea.vmem [#allocation5], %s768_s5 }
  0x27   : > { %s808_s12 = scalar_select %p1021_p5, [#allocation0], [#allocation15] }
  0x28   : > { %s242_s22 = sshll.u32 %s222_s20, 4  ;;  %s943_s6 = smov 2048   ;;  %s243_s22 = int_to_ptr.vmem [resolvable:$true] %s242_s22 }
  0x29   : > { %s234_s23 = sld [smem:[%s808_s12]]   ;;  %s944_s8 = smov 1024  }
  0x2a   : > { %809 = sst [smem:[#allocation11]] (%p1021_p5), %s943_s6  ;;  %s945_s0 = smov 4  }
  0x2b   : > { %810 = sst [smem:[#allocation11 + $0x1]] (%p1021_p5), %s944_s8  ;;  %s946_s11 = smov 256  }
  0x2c   : > { %811 = sst [smem:[#allocation11 + $0x2]] (%p1021_p5), %s945_s0  ;;  %s947_s5 = smov 16  }
  0x2d   : > { %812 = sst [smem:[#allocation11 + $0x3]] (%p1021_p5), %s946_s11  ;;  %s219_s9 = scalar_lea.sflag [#allocation6], %s1042_s29 }
  0x2e   : > { %813 = sst [smem:[#allocation11 + $0x4]] (%p1021_p5), %s946_s11  ;;  %s948_s10 = smov 131072  }
  0x2f   : > { %s778_s30 = sshll.u32 %s234_s23, 26  ;;  %814 = sst [smem:[#allocation11 + $0x5]] (%p1021_p5), %s947_s5 }
  0x30   : > { %s779_s7 = sadd.s32 134217728, %s778_s30 }
  0x31   : > { %815 = dma.general (%p1021_p5), %s229_s14, 2048, %s243_s22, %s219_s9, %s948_s10, [#allocation11], %s779_s7, 0  }
  0x32 PF: > { %p780_p12 = scmp.ge.s32.totalorder %s935_s18, 1  ;;  %p281_p13 = scmp.lt.s32.totalorder %s935_s18, 3 }
  0x34   : > { %p282_p0 = pnand %p780_p12, %p281_p13 }
  0x35   : > { %s1089_s13 = sand.u32 (!%p282_p0), 1, %s927_s16  }
  0x36   : > { %285 = sbr.rel (%p282_p0) target bundleno = 415 (0x19f), region = 36  ;;  %s1092_s12 = sshll.u32 (!%p282_p0), %s1089_s13, 7 }
  0x37   : > { %s288_s29 = scalar_lea.sflag (!%p282_p0), [#allocation3], %s1089_s13  ;;  %s1096_s20 = scalar_lea.vmem (!%p282_p0), [#allocation2], %s1092_s12 }
  0x3b   : > { %910 = dma.done.wait (%p1025_p6), %s288_s29, 2048  }
  0x3c   : > { %912 = vsyncadd (%p1025_p6), %s288_s29, 4294965248  ;;  %s297_s25 = scalar_lea.sflag [#allocation6], %s1089_s13  ;;  %s1104_s14 = scalar_lea.vmem [#allocation5], %s1092_s12 }
  0x3d   : > { %914 = dma.done.wait (%p1025_p6), %s297_s25, 2048  }
  0x3e   : > { %916 = vsyncadd (%p1025_p6), %s297_s25, 4294965248  ;;  %v1111_v0 = vld [vmem:[%s1096_s20 + $0x20] sm:$0xff]  ;;  %v1114_v1 = vld [vmem:[%s1096_s20 + $0x28] sm:$0xff]  ;;  %v949_v48 = vmov 0   ;;  %s784_s26 = sshll.u32 %s1003_s19, 2  ;;  %s1230_s5 = scalar_lea.vmem [#allocation7], %s1092_s12 }
  0x3f   : > { %v1117_v2 = vld [vmem:[%s1096_s20] sm:$0xff]  ;;  %v377_v3 = vadd.f32 %v1114_v1, %v1111_v0  ;;  %v1122_v4 = vld [vmem:[%s1096_s20 + $0x8] sm:$0xff]  ;;  %v1125_v5 = vld [vmem:[%s1096_s20 + $0x30] sm:$0xff]  ;;  %v403_v32 = vmul.f32 %v1111_v0, %v1111_v0  ;;  %v404_v33 = vmul.f32 %v1114_v1, %v1114_v1  ;;  %884 = vset.pattern.permute.xlu1 %v949_v48  ;;  %883 = vset.pattern.permute.xlu0 %v949_v48  ;;  %p343_p1 = scmp.lt.s32.totalorder %s784_s26, 7  ;;  %s608_s7 = scalar_lea.sflag [#allocation4], %s1089_s13 }
  0x40   : > { %v1128_v6 = vld [vmem:[%s1096_s20 + $0x38] sm:$0xff]  ;;  %v371_v7 = vadd.f32 %v1122_v4, %v1117_v2  ;;  %v1133_v8 = vld [vmem:[%s1096_s20 + $0x10] sm:$0xff]  ;;  %v1149_v14 = vld [vmem:[%s1096_s20 + $0x40] sm:$0xff]  ;;  %v399_v26 = vmul.f32 %v1117_v2, %v1117_v2  ;;  %v400_v27 = vmul.f32 %v1122_v4, %v1122_v4  ;;  %v405_v29 = vmul.f32 %v1125_v5, %v1125_v5 }
  0x41   : > { %v1136_v9 = vld [vmem:[%s1096_s20 + $0x18] sm:$0xff]  ;;  %378 = vadd.xlane.f32.xlu1 %v377_v3  ;;  %v380_v10 = vadd.f32 %v1128_v6, %v1125_v5  ;;  %v1143_v12 = vld [vmem:[%s1096_s20 + $0x50] sm:$0xff]  ;;  %v1152_v15 = vld [vmem:[%s1096_s20 + $0x48] sm:$0xff]  ;;  %v401_v23 = vmul.f32 %v1133_v8, %v1133_v8  ;;  %v406_v30 = vmul.f32 %v1128_v6, %v1128_v6  ;;  %v421_v37 = vadd.f32 %v404_v33, %v403_v32  ;;  %s1318_s26 = smov (!%p343_p1, %s784_s26), 7 }
  0x42   : > { %372 = vadd.xlane.f32.xlu0 %v371_v7  ;;  %v374_v11 = vadd.f32 %v1136_v9, %v1133_v8  ;;  %v1146_v13 = vld [vmem:[%s1096_s20 + $0x58] sm:$0xff]  ;;  %v383_v17 = vadd.f32 %v1152_v15, %v1149_v14  ;;  %v1159_v18 = vld [vmem:[%s1096_s20 + $0x70] sm:$0xff]  ;;  %v1165_v20 = vld [vmem:[%s1096_s20 + $0x60] sm:$0xff]  ;;  %v402_v24 = vmul.f32 %v1136_v9, %v1136_v9  ;;  %v415_v31 = vadd.f32 %v400_v27, %v399_v26  ;;  %s785_s22 = sshll.u32 %s1318_s26, 3 }
  0x43   : > { %v386_v16 = vadd.f32 %v1146_v13, %v1143_v12  ;;  %v1162_v19 = vld [vmem:[%s1096_s20 + $0x78] sm:$0xff]  ;;  %v1168_v21 = vld [vmem:[%s1096_s20 + $0x68] sm:$0xff]  ;;  %v424_v34 = vadd.f32 %v406_v30, %v405_v29  ;;  %v409_v35 = vmul.f32 %v1143_v12, %v1143_v12  ;;  %v410_v36 = vmul.f32 %v1146_v13, %v1146_v13  ;;  %s346_s8 = scalar_lea.vmem %s1304_s2, %s785_s22  ;;  %s352_s30 = scalar_lea.vmem %s1305_s3, %s785_s22 }
  0x44   : > { %v392_v22 = vadd.f32 %v1162_v19, %v1159_v18  ;;  %v389_v25 = vadd.f32 %v1168_v21, %v1165_v20  ;;  %v418_v28 = vadd.f32 %v402_v24, %v401_v23  ;;  %v407_v38 = vmul.f32 %v1149_v14, %v1149_v14 }
  0x45   : > { %381 = vadd.xlane.f32.xlu1 %v380_v10  ;;  %v408_v39 = vmul.f32 %v1152_v15, %v1152_v15  ;;  %v430_v40 = vadd.f32 %v410_v36, %v409_v35  ;;  %v413_v41 = vmul.f32 %v1159_v18, %v1159_v18  ;;  %v414_v42 = vmul.f32 %v1162_v19, %v1162_v19 }
  0x46   : > { %375 = vadd.xlane.f32.xlu0 %v374_v11  ;;  %v411_v44 = vmul.f32 %v1165_v20, %v1165_v20  ;;  %v412_v45 = vmul.f32 %v1168_v21, %v1168_v21 }
  0x47   : > { %v427_v43 = vadd.f32 %v408_v39, %v407_v38  ;;  %v436_v46 = vadd.f32 %v414_v42, %v413_v41 }
  0x48   : > { %v433_v47 = vadd.f32 %v412_v45, %v411_v44  ;;  %v468_v45 = vld [vmem:[%s346_s8 + $0x8] sm:$0xff] }
  0x49   : > { %387 = vadd.xlane.f32.xlu1 %v386_v16 }
  0x4a   : > { %384 = vadd.xlane.f32.xlu0 %v383_v17 }
  0x4d   : > { %393 = vadd.xlane.f32.xlu1 %v392_v22 }
  0x4e   : > { %390 = vadd.xlane.f32.xlu0 %v389_v25 }
  0x51   : > { %419 = vadd.xlane.f32.xlu1 %v418_v28 }
  0x52   : > { %416 = vadd.xlane.f32.xlu0 %v415_v31 }
  0x55   : > { %425 = vadd.xlane.f32.xlu1 %v424_v34 }
  0x56   : > { %422 = vadd.xlane.f32.xlu0 %v421_v37 }
  0x59   : > { %431 = vadd.xlane.f32.xlu1 %v430_v40 }
  0x5a   : > { %428 = vadd.xlane.f32.xlu0 %v427_v43 }
  0x5d   : > { %437 = vadd.xlane.f32.xlu1 %v436_v46  ;;  %v467_v46 = vld [vmem:[%s346_s8] sm:$0xff] }
  0x5e   : > { %434 = vadd.xlane.f32.xlu0 %v433_v47 }
  0xca   : > { %v379_v49 = vpop.xlane.xlu1 %378 }
  0xcb   : > { %v373_v50 = vpop.xlane.xlu0 %372 }
  0xce   : > { %v382_v51 = vpop.xlane.xlu1 %381 }
  0xcf   : > { %v376_v52 = vpop.xlane.xlu0 %375 }
  0xd2   : > { %v388_v53 = vpop.xlane.xlu1 %387 }
  0xd3   : > { %v385_v54 = vpop.xlane.xlu0 %384  ;;  %v396_v59 = vadd.f32 %v388_v53, %v376_v52 }
  0xd4   : > { %v395_v60 = vadd.f32 %v385_v54, %v373_v50 }
  0xd5   : > { %v444_v63 = vmul.f32 0.001953125, %v396_v59 }
  0xd6   : > { %v394_v55 = vpop.xlane.xlu1 %393  ;;  %v443_v7 = vmul.f32 0.001953125, %v395_v60 }
  0xd7   : > { %v391_v56 = vpop.xlane.xlu0 %390  ;;  %v398_v3 = vadd.f32 %v394_v55, %v382_v51  ;;  %v452_v23 = vmul.f32 %v444_v63, %v444_v63  ;;  %v469_v51 = vld [vmem:[%s346_s8 + $0x10] sm:$0xff]  ;;  %v470_v55 = vld [vmem:[%s346_s8 + $0x18] sm:$0xff] }
  0xd8   : > { %v397_v10 = vadd.f32 %v391_v56, %v379_v49  ;;  %v451_v26 = vmul.f32 %v443_v7, %v443_v7 }
  0xd9   : > { %v446_v24 = vmul.f32 0.001953125, %v398_v3 }
  0xda   : > { %v420_v57 = vpop.xlane.xlu1 %419  ;;  %v445_v27 = vmul.f32 0.001953125, %v397_v10  ;;  %v477_v10 = vld [vmem:[%s352_s30 + $0x10] sm:$0xff] }
  0xdb   : > { %v417_v58 = vpop.xlane.xlu0 %416  ;;  %v454_v35 = vmul.f32 %v446_v24, %v446_v24 }
  0xdc   : > { %v453_v38 = vmul.f32 %v445_v27, %v445_v27 }
  0xde   : > { %v426_v61 = vpop.xlane.xlu1 %425 }
  0xdf   : > { %v423_v62 = vpop.xlane.xlu0 %422 }
  0xe2   : > { %v432_v11 = vpop.xlane.xlu1 %431 }
  0xe3   : > { %v440_v16 = vadd.f32 %v432_v11, %v420_v57  ;;  %v429_v17 = vpop.xlane.xlu0 %428 }
  0xe4   : > { %v439_v22 = vadd.f32 %v429_v17, %v417_v58  ;;  %v475_v58 = vld [vmem:[%s352_s30] sm:$0xff]  ;;  %v478_v17 = vld [vmem:[%s352_s30 + $0x18] sm:$0xff] }
  0xe5   : > { %v448_v25 = vmul.f32 0.001953125, %v440_v16 }
  0xe6   : > { %v447_v28 = vmul.f32 0.001953125, %v439_v22  ;;  %v438_v29 = vpop.xlane.xlu1 %437 }
  0xe7   : > { %v456_v30 = vsub.f32 %v448_v25, %v452_v23  ;;  %v442_v31 = vadd.f32 %v438_v29, %v426_v61  ;;  %v435_v32 = vpop.xlane.xlu0 %434  ;;  %v476_v61 = vld [vmem:[%s352_s30 + $0x8] sm:$0xff] }
  0xe8   : > { %v455_v33 = vsub.f32 %v447_v28, %v451_v26  ;;  %v441_v34 = vadd.f32 %v435_v32, %v423_v62  ;;  %v568_v32 = vld [vmem:[%s1104_s14 + $0x48] sm:$0xff] }
  0xe9   : > { %v460_v36 = vadd.f32 1e-05, %v456_v30  ;;  %v450_v37 = vmul.f32 0.001953125, %v442_v31  ;;  %v559_v30 = vld [vmem:[%s1104_s14] sm:$0xff]  ;;  %v560_v31 = vld [vmem:[%s1104_s14 + $0x8] sm:$0xff] }
  0xea   : > { %v459_v39 = vadd.f32 1e-05, %v455_v33  ;;  %v449_v40 = vmul.f32 0.001953125, %v441_v34 }
  0xeb   : > { %885 = vrsqrt.f32 %v460_v36  ;;  %v458_v41 = vsub.f32 %v450_v37, %v454_v35 }
  0xec   : > { %887 = vrsqrt.f32 %v459_v39  ;;  %v457_v42 = vsub.f32 %v449_v40, %v453_v38 }
  0xed   : > { %v462_v43 = vadd.f32 1e-05, %v458_v41 }
  0xee   : > { %v461_v44 = vadd.f32 1e-05, %v457_v42  ;;  %v561_v42 = vld [vmem:[%s1104_s14 + $0x10] sm:$0xff] }
  0xf0   : > { %889 = vrsqrt.f32 %v461_v44  ;;  %v569_v44 = vld [vmem:[%s1104_s14 + $0x50] sm:$0xff] }
  0xf1   : > { %891 = vrsqrt.f32 %v462_v43  ;;  %v562_v43 = vld [vmem:[%s1104_s14 + $0x18] sm:$0xff] }
  0xf8   : > { %v886_v47 = vpop.eup %885 }
  0xf9   : > { %v888_v48 = vpop.eup %887  ;;  %v472_v49 = vmul.f32 %v886_v47, %v468_v45  ;;  %v570_v45 = vld [vmem:[%s1104_s14 + $0x58] sm:$0xff] }
  0xfa   : > { %v471_v50 = vmul.f32 %v888_v48, %v467_v46 }
  0xfb   : > { %494 = vperm.xlu1 %884, %v472_v49   ;;  %v480_v60 = vmul.f32 %v472_v49, %v444_v63 }
  0xfc   : > { %489 = vperm.xlu0 %883, %v471_v50   ;;  %v479_v57 = vmul.f32 %v471_v50, %v443_v7 }
  0xfd   : > { %v890_v52 = vpop.eup %889  ;;  %v484_v62 = vsub.f32 %v476_v61, %v480_v60 }
  0xfe   : > { %v473_v53 = vmul.f32 %v890_v52, %v469_v51  ;;  %v892_v54 = vpop.eup %891  ;;  %v483_v59 = vsub.f32 %v475_v58, %v479_v57  ;;  %v571_v57 = vld [vmem:[%s1104_s14 + $0x60] sm:$0xff]  ;;  %v572_v58 = vld [vmem:[%s1104_s14 + $0x68] sm:$0xff] }
  0xff   : > { %v474_v56 = vmul.f32 %v892_v54, %v470_v55  ;;  %v563_v55 = vld [vmem:[%s1104_s14 + $0x20] sm:$0xff] }
 0x100   : > { %499 = vperm.xlu1 %884, %v473_v53   ;;  %v481_v3 = vmul.f32 %v473_v53, %v445_v27 }
 0x101   : > { %v482_v16 = vmul.f32 %v474_v56, %v446_v24  ;;  %v567_v24 = vld [vmem:[%s1104_s14 + $0x40] sm:$0xff] }
 0x102   : > { %v485_v11 = vsub.f32 %v477_v10, %v481_v3 }
 0x103   : > { %v486_v22 = vsub.f32 %v478_v17, %v482_v16 }
 0x104   : > { %504 = vperm.xlu1 %884, %v474_v56   ;;  %v564_v56 = vld [vmem:[%s1104_s14 + $0x28] sm:$0xff] }
 0x108   : > { %525 = vperm.xlu1 %884, %v483_v59  }
 0x10c   : > { %530 = vperm.xlu1 %884, %v484_v62  }
 0x110   : > { %535 = vperm.xlu1 %884, %v485_v11  }
 0x114   : > { %540 = vperm.xlu1 %884, %v486_v22   ;;  %v565_v22 = vld [vmem:[%s1104_s14 + $0x30] sm:$0xff] }
 0x176   : > { %v495_v7 = vpop.permute.xlu1 %494 }
 0x177   : > { %v490_v25 = vpop.permute.xlu0 %489  ;;  %v518_v37 = vmul.f32 %v495_v7, %v1146_v13 }
 0x178   : > { %v507_v26 = vmul.f32 %v490_v25, %v1117_v2  ;;  %v508_v27 = vmul.f32 %v490_v25, %v1122_v4  ;;  %v515_v28 = vmul.f32 %v490_v25, %v1149_v14  ;;  %v516_v29 = vmul.f32 %v490_v25, %v1152_v15  ;;  %v574_v25 = vld [vmem:[%s1104_s14 + $0x78] sm:$0xff] }
 0x179   : > { %v509_v4 = vmul.f32 %v495_v7, %v1133_v8  ;;  %v510_v14 = vmul.f32 %v495_v7, %v1136_v9  ;;  %v517_v15 = vmul.f32 %v495_v7, %v1143_v12  ;;  %v566_v7 = vld [vmem:[%s1104_s14 + $0x38] sm:$0xff] }
 0x17b   : > { %v500_v23 = vpop.permute.xlu1 %499 }
 0x17c   : > { %v511_v47 = vmul.f32 %v500_v23, %v1111_v0  ;;  %v512_v48 = vmul.f32 %v500_v23, %v1114_v1  ;;  %v519_v49 = vmul.f32 %v500_v23, %v1165_v20  ;;  %v520_v50 = vmul.f32 %v500_v23, %v1168_v21  ;;  %v573_v23 = vld [vmem:[%s1104_s14 + $0x70] sm:$0xff] }
 0x17f   : > { %v505_v63 = vpop.permute.xlu1 %504 }
 0x180   : > { %v513_v60 = vmul.f32 %v505_v63, %v1125_v5  ;;  %v514_v61 = vmul.f32 %v505_v63, %v1128_v6  ;;  %v521_v62 = vmul.f32 %v505_v63, %v1159_v18  ;;  %v522_v3 = vmul.f32 %v505_v63, %v1162_v19 }
 0x183   : > { %v526_v33 = vpop.permute.xlu1 %525 }
 0x184   : > { %v543_v34 = vadd.f32 %v526_v33, %v507_v26  ;;  %v544_v35 = vadd.f32 %v526_v33, %v508_v27  ;;  %v551_v36 = vadd.f32 %v526_v33, %v515_v28  ;;  %v552_v2 = vadd.f32 %v526_v33, %v516_v29 }
 0x186   : > { %v575_v38 = vadd.f32 %v559_v30, %v543_v34  ;;  %v576_v39 = vadd.f32 %v560_v31, %v544_v35  ;;  %v583_v40 = vadd.f32 %v567_v24, %v551_v36  ;;  %v584_v41 = vadd.f32 %v568_v32, %v552_v2 }
 0x187   : > { %v531_v46 = vpop.permute.xlu1 %530 }
 0x188   : > { %591 = vst [vmem:[%s1230_s5] sm:$0xff] %v575_v38  ;;  %592 = vst [vmem:[%s1230_s5 + $0x8] sm:$0xff] %v576_v39  ;;  %v545_v8 = vadd.f32 %v531_v46, %v509_v4  ;;  %v546_v9 = vadd.f32 %v531_v46, %v510_v14  ;;  %v553_v12 = vadd.f32 %v531_v46, %v517_v15 }
 0x189   : > { %599 = vst [vmem:[%s1230_s5 + $0x40] sm:$0xff] %v583_v40  ;;  %600 = vst [vmem:[%s1230_s5 + $0x48] sm:$0xff] %v584_v41  ;;  %v554_v13 = vadd.f32 %v531_v46, %v518_v37 }
 0x18a   : > { %v577_v51 = vadd.f32 %v561_v42, %v545_v8  ;;  %v578_v52 = vadd.f32 %v562_v43, %v546_v9  ;;  %v585_v53 = vadd.f32 %v569_v44, %v553_v12 }
 0x18b   : > { %v586_v54 = vadd.f32 %v570_v45, %v554_v13  ;;  %v536_v59 = vpop.permute.xlu1 %535 }
 0x18c   : > { %593 = vst [vmem:[%s1230_s5 + $0x10] sm:$0xff] %v577_v51  ;;  %594 = vst [vmem:[%s1230_s5 + $0x18] sm:$0xff] %v578_v52  ;;  %v547_v0 = vadd.f32 %v536_v59, %v511_v47  ;;  %v548_v1 = vadd.f32 %v536_v59, %v512_v48  ;;  %v555_v20 = vadd.f32 %v536_v59, %v519_v49 }
 0x18d   : > { %601 = vst [vmem:[%s1230_s5 + $0x50] sm:$0xff] %v585_v53  ;;  %602 = vst [vmem:[%s1230_s5 + $0x58] sm:$0xff] %v586_v54  ;;  %v556_v21 = vadd.f32 %v536_v59, %v520_v50 }
 0x18e   : > { %v579_v10 = vadd.f32 %v563_v55, %v547_v0  ;;  %v580_v11 = vadd.f32 %v564_v56, %v548_v1  ;;  %v587_v16 = vadd.f32 %v571_v57, %v555_v20 }
 0x18f   : > { %v588_v17 = vadd.f32 %v572_v58, %v556_v21  ;;  %v541_v26 = vpop.permute.xlu1 %540 }
 0x190   : > { %595 = vst [vmem:[%s1230_s5 + $0x20] sm:$0xff] %v579_v10  ;;  %596 = vst [vmem:[%s1230_s5 + $0x28] sm:$0xff] %v580_v11  ;;  %v549_v5 = vadd.f32 %v541_v26, %v513_v60  ;;  %v550_v6 = vadd.f32 %v541_v26, %v514_v61  ;;  %v557_v18 = vadd.f32 %v541_v26, %v521_v62 }
 0x191   : > { %603 = vst [vmem:[%s1230_s5 + $0x60] sm:$0xff] %v587_v16  ;;  %604 = vst [vmem:[%s1230_s5 + $0x68] sm:$0xff] %v588_v17  ;;  %v558_v19 = vadd.f32 %v541_v26, %v522_v3 }
 0x192   : > { %v581_v63 = vadd.f32 %v565_v22, %v549_v5  ;;  %v582_v27 = vadd.f32 %v566_v7, %v550_v6  ;;  %v589_v28 = vadd.f32 %v573_v23, %v557_v18 }
 0x193   : > { %v590_v29 = vadd.f32 %v574_v25, %v558_v19 }
 0x194   : > { %597 = vst [vmem:[%s1230_s5 + $0x30] sm:$0xff] %v581_v63  ;;  %598 = vst [vmem:[%s1230_s5 + $0x38] sm:$0xff] %v582_v27 }
 0x195   : > { %605 = vst [vmem:[%s1230_s5 + $0x70] sm:$0xff] %v589_v28  ;;  %606 = vst [vmem:[%s1230_s5 + $0x78] sm:$0xff] %v590_v29 }
 0x196   : > { %s799_s9 = sshll.u32 %s1003_s19, 10  ;;  %s632_s10 = sshll.u32 %s1230_s5, 4  ;;  %s633_s10 = int_to_ptr.vmem [resolvable:$true] %s632_s10 }
 0x197   : > { %s621_s20 = scalar_lea.hbm %s1306_s4, %s799_s9  ;;  %s950_s25 = smov 1024  }
 0x198   : > { %818 = sst [smem:[#allocation13]] (%p1030_p9), %s950_s25  ;;  %s951_s13 = smov 2048  }
 0x199   : > { %819 = sst [smem:[#allocation13 + $0x1]] (%p1030_p9), %s951_s13  ;;  %s952_s14 = smov 4  }
 0x19a   : > { %820 = sst [smem:[#allocation13 + $0x2]] (%p1030_p9), %s952_s14  ;;  %s953_s26 = smov 256  }
 0x19b   : > { %821 = sst [smem:[#allocation13 + $0x3]] (%p1030_p9), %s953_s26  ;;  %s954_s19 = smov 16  }
 0x19c   : > { %822 = sst [smem:[#allocation13 + $0x4]] (%p1030_p9), %s953_s26  ;;  %s955_s22 = smov 131072  }
 0x19d   : > { %823 = sst [smem:[#allocation13 + $0x5]] (%p1030_p9), %s954_s19  ;;  %s956_s23 = smov 0  }
 0x19e   : > { %824 = dma.general (%p1030_p9), %s633_s10, 2048, %s621_s20, %s608_s7, %s955_s22, [#allocation13], %s956_s23, 0  }
 0x19f PF: > { %s660_s6 = sand.u32 1, %s923_s15   ;;  %p827_p2 = pnand %p767_p11, %p1034_p10 }
 0x1a0   : > { %s661_s8 = scalar_lea.sflag [#allocation4], %s660_s6 }
 0x1a1   : > { %p828_p3 = pneg %p827_p2 }
 0x1a3   : > { %918 = dma.done.wait (%p828_p3), %s661_s8, 2048  }
 0x1a4   : > { %920 = vsyncadd (%p828_p3), %s661_s8, 4294965248  ;;  %p20_p4 = scmp.ge.s32.totalorder %s1007_s21, 4   ;;  %s1313_s15 = smov %s927_s16 }
 0x1a5   : > { %s1314_s16 = smov %s931_s17  ;;  %s1315_s17 = smov %s1019_s24 }
 0x1a6   : > { %s1316_s18 = smov %s1007_s21  ;;  %22 = sbr.rel (!%p20_p4) target bundleno = 9 (0x9), region = 115 }
 0x1ab   :  { %666 = vsyncpa [#allocation3], 1 }
 0x1ac   :  { %668 = vsyncpa [#allocation3 + $0x1], 1 }
 0x1ad   :  { %669 = vsyncpa [#allocation6], 1 }
 0x1ae   :  { %671 = vsyncpa [#allocation6 + $0x1], 1 }
 0x1af   :  { %672 = vsyncpa [#allocation4], 1 }
 0x1b0   :  { %674 = vsyncpa [#allocation4 + $0x1], 1 }

</bundles_post_ra>
